<compile_context>
chip_gen: v7x
topology: tpu7x:2x2x1
jax: 0.10.0
libtpu: 0.0.40
codegen_flags: <defaults>
</compile_context>

<pallas_src>
import math
import functools

import jax
import jax.numpy as jnp
from jax.experimental import pallas as pl
from jax.experimental.pallas import tpu as pltpu


# --------------------------- small math helpers ------------------------------

def _layer_norm(x, g, b, eps=1e-5):
    mu = jnp.mean(x, axis=-1, keepdims=True)
    var = jnp.mean((x - mu) ** 2, axis=-1, keepdims=True)
    return (x - mu) * jax.lax.rsqrt(var + eps) * g + b


def _gelu(x):
    # TODO(synk): PyTorch F.gelu uses the exact erf form; tanh approximation here.
    c = math.sqrt(2.0 / math.pi)
    return 0.5 * x * (1.0 + jnp.tanh(c * (x + 0.044715 * x * x * x)))


# ----------------------- hardware-aware configuration ------------------------

def _tpu_vmem_bytes():
    """Best-effort per-core VMEM capacity; conservative v7x default on failure."""
    try:
        info = pltpu.get_tpu_info()
        for attr in ("vmem_capacity_bytes", "vmem_bytes", "vmem_size_bytes"):
            v = getattr(info, attr, None)
            if v:
                return int(v)
    except Exception:
        pass
    return 64 * 1024 * 1024


# ------------------ single-buffered weight BlockSpec helper ------------------

@functools.lru_cache(maxsize=None)
def _buffered_one_supported():
    """True iff BlockSpec(pipeline_mode=pl.Buffered(1)) compiles+runs here."""
    try:
        def k(x_ref, w_ref, o_ref):
            o_ref[...] = x_ref[...] + w_ref[...]
        z = jnp.zeros((8, 128), jnp.float32)
        out = pl.pallas_call(
            k,
            out_shape=jax.ShapeDtypeStruct((8, 128), jnp.float32),
            grid=(2,),
            in_specs=[pl.BlockSpec((8, 128), lambda i: (0, 0)),
                      pl.BlockSpec((8, 128), lambda i: (0, 0),
                                   pipeline_mode=pl.Buffered(1))],
            out_specs=pl.BlockSpec((8, 128), lambda i: (0, 0)),
        )(z, z)
        jax.block_until_ready(out)
        return True
    except Exception:
        return False


def _const_block_spec(shape):
    """BlockSpec for a grid-invariant operand; single-buffered when supported."""
    nd = len(shape)
    idx = lambda *args: (0,) * nd
    if _buffered_one_supported():
        return pl.BlockSpec(shape, idx, pipeline_mode=pl.Buffered(1))
    # TODO(synk): if Buffered(1) is unsupported, a memory_space=pl.ANY weight blob
    # DMA'd once into VMEM scratch would avoid double-buffering large weights.
    return pl.BlockSpec(shape, idx)


# ----------------------------- Pallas kernels --------------------------------

def emb_layer_norm_kernel(x_ref, g_ref, b_ref, o_ref):
    x = x_ref[...].astype(jnp.float32)                      # (rows_tile, C)
    o_ref[...] = _layer_norm(x, g_ref[...].astype(jnp.float32),
                             b_ref[...].astype(jnp.float32)).astype(o_ref.dtype)


def emb_layer_norm(x, gamma, beta, out_dtype=jnp.bfloat16):
    """Row-wise LayerNorm over merged B*T rows, tiled in large row blocks."""
    B, T, C = x.shape
    rows = B * T
    xr = x.reshape(rows, C)
    max_tile = 1024                                          # HBM-bound; big tiles
    if rows <= max_tile:
        rt, padded = rows, rows
    else:
        rt = max_tile
        padded = -(-rows // rt) * rt
        xr = jnp.pad(xr, ((0, padded - rows), (0, 0)))
    out = pl.pallas_call(
        emb_layer_norm_kernel,
        out_shape=jax.ShapeDtypeStruct((padded, C), out_dtype),
        grid=(padded // rt,),
        in_specs=[pl.BlockSpec((rt, C), lambda i: (i, 0)),
                  _const_block_spec(gamma.shape),
                  _const_block_spec(beta.shape)],
        out_specs=pl.BlockSpec((rt, C), lambda i: (i, 0)),
        compiler_params=pltpu.CompilerParams(dimension_semantics=("parallel",)),
    )(xr, gamma, beta)
    return out[:rows].reshape(B, T, C)


def encoder_layer_kernel(x_ref, bias_ref,
                         ln1_g_ref, ln1_b_ref, wqT_ref, bq_ref, wkvT_ref, bkv_ref,
                         wo_ref, bo_ref, ln2_g_ref, ln2_b_ref,
                         w1_ref, b1_ref, w2_ref, b2_ref,
                         o_ref, hf_ref, kv_ref,
                         *, num_heads, head_dim, q_tile):
    f32 = jnp.float32
    H, d, tq = num_heads, head_dim, q_tile
    cdt = wqT_ref.dtype                                      # bf16 compute dtype
    Tk = kv_ref.shape[-1]                                    # padded sequence length
    C = H * d

    # ---- K/V (and full-sequence pre-LN) computed once per batch element and
    #      cached in VMEM scratch across the query-tile ("arbitrary") axis ----
    @pl.when(pl.program_id(1) == 0)
    def _():
        x_full = x_ref[0].astype(f32)                        # (Tk, C)
        h_full = _layer_norm(x_full, ln1_g_ref[...].astype(f32),
                             ln1_b_ref[...].astype(f32))
        h_bf = h_full.astype(cdt)
        hf_ref[...] = h_bf
        # fused, transposed K|V projection: one 2D MXU matmul with K = C
        kvT = jax.lax.dot_general(wkvT_ref[...], h_bf,
                                  (((1,), (1,)), ((), ())),
                                  preferred_element_type=f32)  # (2C, Tk)
        kv_ref[...] = (kvT.reshape(2 * H, d, Tk)
                       + bkv_ref[...].astype(f32)).astype(cdt)

    # ---- per-query-tile inputs: plain slices, no recomputed LayerNorm ----
    if tq == Tk:
        x_q = x_ref[0].astype(f32)                           # (tq, C)
        h_q = hf_ref[...]                                    # (tq, C) bf16
    else:
        start = pl.multiple_of(pl.program_id(1) * tq, tq)
        x_q = x_ref[0, pl.ds(start, tq), :].astype(f32)
        h_q = hf_ref[pl.ds(start, tq), :]

    # Q projection, transposed, attention scale folded into wqT/bq at the wrapper.
    # (H, d, tq) layout: lane dim stays tq (>=128), no per-head swapaxes.
    qT = jax.lax.dot_general(wqT_ref[...], h_q, (((1,), (1,)), ((), ())),
                             preferred_element_type=f32)     # (C, tq)
    qh = (qT.reshape(H, d, tq) + bq_ref[...].astype(f32)).astype(cdt)

    kv = kv_ref[...]                                         # (2H, d, Tk)
    kh, vh = kv[:H], kv[H:]

    # ---- head-batched attention; key-pad mask pre-folded into the bias ----
    # TODO(synk): for Tp >= ~1024 add flash-style key tiling (online softmax) so
    # the live set is O(tq*tk) instead of O(tq*Tp).
    s = jax.lax.dot_general(qh, kh, (((1,), (1,)), ((0,), (0,))),
                            preferred_element_type=f32)      # (H, tq, Tk)
    s = s + bias_ref[0].astype(f32)

    m = jnp.max(s, axis=-1, keepdims=True)
    e = jnp.exp(s - m)
    denom = jnp.sum(e, axis=-1, keepdims=True)
    p = (e * pl.reciprocal(denom, approx=True)).astype(cdt)  # (H, tq, Tk)

    ctx = jax.lax.dot_general(vh, p, (((2,), (2,)), ((0,), (0,))),
                              preferred_element_type=f32)    # (H, d, tq)
    # fused output projection: single 2D MXU matmul with K = H*d = C
    attn = jax.lax.dot_general(ctx.reshape(C, tq).astype(cdt), wo_ref[...],
                               (((0,), (0,)), ((), ())),
                               preferred_element_type=f32)   # (tq, C)
    attn = attn + bo_ref[...].astype(f32)
    x1 = x_q + attn

    # ---- feed forward (pre-LN) ----
    h2 = _layer_norm(x1, ln2_g_ref[...].astype(f32),
                     ln2_b_ref[...].astype(f32)).astype(cdt)
    ff = jnp.dot(h2, w1_ref[...], preferred_element_type=f32) + b1_ref[...].astype(f32)
    ff = _gelu(ff).astype(cdt)
    ff = jnp.dot(ff, w2_ref[...], preferred_element_type=f32) + b2_ref[...].astype(f32)
    x2 = x1 + ff

    o_ref[0] = x2.astype(o_ref.dtype)


def encoder_layer(x, attn_bias, lp, *, num_heads, q_tile, vmem_limit_bytes):
    """x: [B, Tp, C] bf16; attn_bias: [B, H, Tp, Tp] bf16 (key-pad mask folded in)."""
    B, Tp, C = x.shape
    H = num_heads
    d = C // H
    nq = Tp // q_tile
    cdt = lp['wqT'].dtype

    weights = [lp['ln1_g'], lp['ln1_b'], lp['wqT'], lp['bq3'], lp['wkvT'], lp['bkv3'],
               lp['wo'], lp['bo'], lp['ln2_g'], lp['ln2_b'],
               lp['w1'], lp['b1'], lp['w2'], lp['b2']]

    kernel = functools.partial(encoder_layer_kernel,
                               num_heads=H, head_dim=d, q_tile=q_tile)
    return pl.pallas_call(
        kernel,
        out_shape=jax.ShapeDtypeStruct((B, Tp, C), x.dtype),
        grid=(B, nq),
        in_specs=[
            pl.BlockSpec((1, Tp, C), lambda b, qi: (b, 0, 0)),
            pl.BlockSpec((1, H, q_tile, Tp), lambda b, qi: (b, 0, qi, 0)),
        ] + [_const_block_spec(w.shape) for w in weights],
        out_specs=pl.BlockSpec((1, q_tile, C), lambda b, qi: (b, qi, 0)),
        scratch_shapes=[pltpu.VMEM((Tp, C), cdt),            # cached pre-LN acts
                        pltpu.VMEM((2 * H, d, Tp), cdt)],    # cached K|V heads
        compiler_params=pltpu.CompilerParams(
            dimension_semantics=("parallel", "arbitrary"),
            vmem_limit_bytes=vmem_limit_bytes),
    )(x, attn_bias, *weights)


# ------------------------ parameter initialization ---------------------------

def init_params(key, cfg):
    C = cfg['embedding_dim']
    F = cfg['ffn_embedding_dim']
    H = cfg['num_heads']
    L = cfg['num_layers']
    Ht = H * (L + 1)
    std = 0.02
    keys = iter(jax.random.split(key, 64))

    def nrm(shape):
        return std * jax.random.normal(next(keys), shape, jnp.float32)

    def emb(num, dim):
        w = nrm((num, dim))
        return w.at[0].set(0.0)     # padding_idx = 0

    p = {}
    p['atom_encoder'] = emb(cfg['num_atoms'] + 1, C)
    p['in_degree_encoder'] = emb(cfg['num_in_degree'], C)
    p['out_degree_encoder'] = emb(cfg['num_out_degree'], C)
    p['graph_token'] = nrm((1, C))
    p['spatial_pos_encoder'] = emb(cfg['num_spatial'], Ht)
    p['edge_encoder'] = emb(cfg['num_edges'] + 1, Ht)
    p['graph_token_virtual_distance'] = nrm((1, Ht))
    p['emb_ln_g'] = jnp.ones((1, C), jnp.float32)
    p['emb_ln_b'] = jnp.zeros((1, C), jnp.float32)

    # init_scale = sqrt(log(num_encoder_layers)) applied to fc1/fc2/out_proj/v_proj
    init_scale = math.sqrt(math.log(L))
    layers = []
    for _ in range(L):
        layers.append(dict(
            ln1_g=jnp.ones((1, C), jnp.float32), ln1_b=jnp.zeros((1, C), jnp.float32),
            wq=nrm((C, C)), bq=jnp.zeros((1, C), jnp.float32),
            wk=nrm((C, C)), bk=jnp.zeros((1, C), jnp.float32),
            wv=nrm((C, C)) * init_scale, bv=jnp.zeros((1, C), jnp.float32),
            wo=nrm((C, C)) * init_scale, bo=jnp.zeros((1, C), jnp.float32),
            ln2_g=jnp.ones((1, C), jnp.float32), ln2_b=jnp.zeros((1, C), jnp.float32),
            w1=nrm((C, F)) * init_scale, b1=jnp.zeros((1, F), jnp.float32),
            w2=nrm((F, C)) * init_scale, b2=jnp.zeros((1, C), jnp.float32),
        ))
    p['layers'] = layers
    return p


def prepare_kernel_params(params, cfg):
    """Kernel-layout weights: transposed/fused projections, bf16, scale folded."""
    C = cfg['embedding_dim']
    H = cfg['num_heads']
    d = C // H
    bf16 = jnp.bfloat16
    scaling = 1.0 / math.sqrt(d)
    layers = []
    for lp in params['layers']:
        wqT = (lp['wq'] * scaling).T.astype(bf16)                        # (C, C)
        bq3 = (lp['bq'].reshape(C) * scaling).reshape(H, d, 1)           # f32
        wkvT = jnp.concatenate([lp['wk'], lp['wv']], axis=1).T.astype(bf16)  # (2C, C)
        bkv3 = jnp.concatenate([lp['bk'].reshape(C),
                                lp['bv'].reshape(C)]).reshape(2 * H, d, 1)
        layers.append(dict(
            ln1_g=lp['ln1_g'], ln1_b=lp['ln1_b'],
            wqT=wqT, bq3=bq3, wkvT=wkvT, bkv3=bkv3,
            wo=lp['wo'].astype(bf16), bo=lp['bo'],                       # (C, C)
            ln2_g=lp['ln2_g'], ln2_b=lp['ln2_b'],
            w1=lp['w1'].astype(bf16), b1=lp['b1'],
            w2=lp['w2'].astype(bf16), b2=lp['b2']))
    return dict(emb_ln_g=params['emb_ln_g'], emb_ln_b=params['emb_ln_b'],
                layers=layers)


# ------------------------------- forward pass ---------------------------------

def graphormer_sentence_encoder_forward(params, batched, cfg):
    H = cfg['num_heads']
    L = cfg['num_layers']
    Ht = H * (L + 1)

    data_x = batched['x']                       # (B, N, nfeat) int32
    B, N = data_x.shape[:2]
    T = N + 1
    pos = batched['pos']                        # args.ft=True -> no noise injection

    # padding mask: x[:, :, 0] == 0, CLS token never padded
    padding_mask = (data_x[:, :, 0] == 0)
    padding_mask = jnp.concatenate(
        [jnp.zeros((B, 1), dtype=bool), padding_mask], axis=1)       # (B, T)

    # ---- GraphNodeFeature (embedding gathers: plain-JAX glue) ----
    node_feat = jnp.take(params['atom_encoder'], data_x, axis=0).sum(axis=-2)
    node_feat = node_feat + jnp.take(params['in_degree_encoder'],
                                     batched['in_degree'], axis=0)
    node_feat = node_feat + jnp.take(params['out_degree_encoder'],
                                     batched['out_degree'], axis=0)
    C = node_feat.shape[-1]
    graph_token = jnp.broadcast_to(params['graph_token'][None], (B, 1, C))
    x = jnp.concatenate([graph_token, node_feat], axis=1)            # (B, T, C) f32

    # ---- GraphAttnBias (embedding gathers: plain-JAX glue) ----
    ab_in = batched['attn_bias']                                     # (B, T, T)
    g = jnp.broadcast_to(ab_in[:, None], (B, Ht, T, T))
    sp_bias = jnp.transpose(
        jnp.take(params['spatial_pos_encoder'], batched['spatial_pos'], axis=0),
        (0, 3, 1, 2))                                                # (B, Ht, N, N)
    edge_bias = jnp.transpose(
        jnp.take(params['edge_encoder'], batched['attn_edge_type'], axis=0).mean(-2),
        (0, 3, 1, 2))                                                # (B, Ht, N, N)
    tvd = params['graph_token_virtual_distance'].reshape(1, Ht, 1)
    g = g.at[:, :, 1:, 1:].add(sp_bias)
    g = g.at[:, :, 1:, 0].add(tvd)
    g = g.at[:, :, 0, :].add(tvd)
    g = g.at[:, :, 1:, 1:].add(edge_bias)
    attn_bias = g + ab_in[:, None]                                   # (B, Ht, T, T) f32

    # ---- embedding LayerNorm (Pallas, B*T rows fused), activations -> bf16 ----
    x = emb_layer_norm(x, params['emb_ln_g'], params['emb_ln_b'],
                       out_dtype=jnp.bfloat16)

    inner_states = [jnp.transpose(x, (1, 0, 2))]          # T x B x C convention

    attn_bias_r = attn_bias.reshape(B, L + 1, H, T, T)

    # ---- generation-aware padding / query-tile / VMEM-budget selection ----
    vmem_cap = _tpu_vmem_bytes()
    qt_target = 256 if vmem_cap >= 96 * 1024 * 1024 else 128  # v7x (64 MiB) -> 128
    Tp = -(-T // 128) * 128                                   # lane-dense key dim
    if Tp <= qt_target:
        q_tile = Tp
    else:
        q_tile = qt_target
        Tp = -(-T // q_tile) * q_tile
    pad_t = Tp - T
    vmem_limit = max(32 * 1024 * 1024,
                     min(int(vmem_cap * 3 // 4), 112 * 1024 * 1024))

    if pad_t:
        x = jnp.pad(x, ((0, 0), (0, pad_t), (0, 0)))
    key_pad = jnp.pad(padding_mask, ((0, 0), (0, pad_t)),
                      constant_values=True)                   # (B, Tp) padded keys
    bias_layers = attn_bias_r
    if pad_t:
        bias_layers = jnp.pad(attn_bias_r,
                              ((0, 0), (0, 0), (0, 0), (0, pad_t), (0, pad_t)))
    # fold the key-padding mask into the bias once: removes the in-kernel
    # compare+select and the mask DMA stream entirely (-1e30 is bf16-representable).
    bias_layers = jnp.where(key_pad[:, None, None, None, :],
                            jnp.float32(-1e30), bias_layers)
    bias_layers = bias_layers.astype(jnp.bfloat16)            # bf16 bias DMA stream
    # TODO(synk): int8/fp8 bias compression (per-head scale) would halve the
    # dominant HBM stream again (biggest win on v5e); kept bf16 for simplicity.

    kparams = prepare_kernel_params(params, cfg)

    # ---- transformer encoder layers (Pallas hot path) ----
    for nl in range(L):
        x = encoder_layer(x, bias_layers[:, nl], kparams['layers'][nl],
                          num_heads=H, q_tile=q_tile, vmem_limit_bytes=vmem_limit)
        inner_states.append(jnp.transpose(x[:, :T], (1, 0, 2)))

    x_tbc = jnp.transpose(x[:, :T], (1, 0, 2))
    delta_pos = None            # graph_3d_bias disabled (add_3d=False)
    pbc_expand_batched = None   # use_pbc=False
    return (x_tbc, attn_bias_r, delta_pos, pos, inner_states,
            padding_mask, pbc_expand_batched)


# ----------------------------------- main -------------------------------------

if __name__ == "__main__":
    cfg = dict(embedding_dim=32, ffn_embedding_dim=64, num_heads=4, num_layers=2,
               num_atoms=64, num_in_degree=16, num_out_degree=16,
               num_edges=32, num_spatial=16)
    B, N, nfeat, nefeat = 2, 8, 3, 1
    T = N + 1

    # probe single-buffered weight support once, eagerly (outside any trace)
    _buffered_one_supported()

    key = jax.random.PRNGKey(0)
    kp, kd = jax.random.split(key)
    params = init_params(kp, cfg)

    ks = jax.random.split(kd, 8)
    data_x = jax.random.randint(ks[0], (B, N, nfeat), 1, cfg['num_atoms'] + 1,
                                dtype=jnp.int32)
    data_x = data_x.at[1, -1, :].set(0)        # one padded node in graph 1
    in_degree = jax.random.randint(ks[1], (B, N), 1, cfg['num_in_degree'],
                                   dtype=jnp.int32).at[1, -1].set(0)
    out_degree = jax.random.randint(ks[2], (B, N), 1, cfg['num_out_degree'],
                                    dtype=jnp.int32).at[1, -1].set(0)
    spatial_pos = jax.random.randint(ks[3], (B, N, N), 1, cfg['num_spatial'],
                                     dtype=jnp.int32)
    attn_edge_type = jax.random.randint(ks[4], (B, N, N, nefeat), 1,
                                        cfg['num_edges'] + 1, dtype=jnp.int32)
    attn_bias_in = jnp.zeros((B, T, T), jnp.float32)
    pos = jax.random.normal(ks[5], (B, N, 3), jnp.float32)

    batched = dict(x=data_x, in_degree=in_degree, out_degree=out_degree,
                   spatial_pos=spatial_pos, attn_edge_type=attn_edge_type,
                   attn_bias=attn_bias_in, pos=pos)

    out = graphormer_sentence_encoder_forward(params, batched, cfg)
    x_tbc, attn_bias_r, delta_pos, pos_out, inner_states, padding_mask, pbc = out
    jax.block_until_ready(x_tbc)

    assert x_tbc.shape == (T, B, cfg['embedding_dim'])
    assert attn_bias_r.shape == (B, cfg['num_layers'] + 1, cfg['num_heads'], T, T)
    assert len(inner_states) == cfg['num_layers'] + 1
    assert bool(jnp.all(jnp.isfinite(x_tbc.astype(jnp.float32))))
    print("KERNEL_OK")
</pallas_src>

<mosaic_0001>
module attributes {stable_mosaic.version = 11 : i64} {
  func.func @k(%arg0: i32, %arg1: memref<8x128xf32, #tpu.memory_space<vmem>>, %arg2: memref<8x128xf32, #tpu.memory_space<vmem>>, %arg3: memref<8x128xf32, #tpu.memory_space<vmem>>) attributes {dimension_semantics = [#tpu.dimension_semantics<arbitrary>], iteration_bounds = array<i64: 2>, scalar_prefetch = 0 : i64, scratch_operands = 0 : i64, tpu.core_type = #tpu.core_type<tc>, window_params = [{pipeline_mode = #tpu.pipeline_mode<synchronous>, transform_indices = @transform_0, window_bounds = array<i64: 8, 128>}, {pipeline_mode = #tpu.pipeline_mode<synchronous>, transform_indices = @transform_1, window_bounds = array<i64: 8, 128>}, {pipeline_mode = #tpu.pipeline_mode<synchronous>, transform_indices = @transform_2, window_bounds = array<i64: 8, 128>}]} {
    %c0 = arith.constant 0 : index
    %c0_0 = arith.constant 0 : index
    %0 = vector.load %arg1[%c0, %c0_0] : memref<8x128xf32, #tpu.memory_space<vmem>>, vector<8x128xf32>
    %c0_1 = arith.constant 0 : index
    %c0_2 = arith.constant 0 : index
    %1 = vector.load %arg2[%c0_1, %c0_2] : memref<8x128xf32, #tpu.memory_space<vmem>>, vector<8x128xf32>
    %2 = arith.addf %0, %1 : vector<8x128xf32>
    %c0_3 = arith.constant 0 : index
    %c0_4 = arith.constant 0 : index
    %3 = vector.load %arg3[%c0_3, %c0_4] : memref<8x128xf32, #tpu.memory_space<vmem>>, vector<8x128xf32>
    tpu.vector_store %arg3[%c0_3, %c0_4], %2 {strides = array<i32>} : memref<8x128xf32, #tpu.memory_space<vmem>>, vector<8x128xf32>,
    return
  }
  func.func @transform_0(%arg0: i32) -> (i32, i32) {
    %c0_i32 = arith.constant 0 : i32
    %c0_i32_0 = arith.constant 0 : i32
    %c0_i32_1 = arith.constant 0 : i32
    return %c0_i32, %c0_i32_0 : i32, i32
  }
  func.func @transform_1(%arg0: i32) -> (i32, i32) {
    %c0_i32 = arith.constant 0 : i32
    %c0_i32_0 = arith.constant 0 : i32
    %c0_i32_1 = arith.constant 0 : i32
    return %c0_i32, %c0_i32_0 : i32, i32
  }
  func.func @transform_2(%arg0: i32) -> (i32, i32) {
    %c0_i32 = arith.constant 0 : i32
    %c0_i32_0 = arith.constant 0 : i32
    %c0_i32_1 = arith.constant 0 : i32
    return %c0_i32, %c0_i32_0 : i32, i32
  }
}

module attributes {stable_mosaic.version = 11 : i64} {
  func.func @emb_layer_norm_kernel(%arg0: i32, %arg1: memref<18x32xf32, #tpu.memory_space<vmem>>, %arg2: memref<1x32xf32, #tpu.memory_space<vmem>>, %arg3: memref<1x32xf32, #tpu.memory_space<vmem>>, %arg4: memref<18x32xbf16, #tpu.memory_space<vmem>>) attributes {dimension_semantics = [#tpu.dimension_semantics<parallel>], iteration_bounds = array<i64: 1>, scalar_prefetch = 0 : i64, scratch_operands = 0 : i64, tpu.core_type = #tpu.core_type<tc>, window_params = [{transform_indices = @transform_0, window_bounds = array<i64: 18, 32>}, {pipeline_mode = #tpu.pipeline_mode<synchronous>, transform_indices = @transform_1, window_bounds = array<i64: 1, 32>}, {pipeline_mode = #tpu.pipeline_mode<synchronous>, transform_indices = @transform_2, window_bounds = array<i64: 1, 32>}, {transform_indices = @transform_3, window_bounds = array<i64: 18, 32>}]} {
    %c0 = arith.constant 0 : index
    %c0_0 = arith.constant 0 : index
    %0 = vector.load %arg1[%c0, %c0_0] : memref<18x32xf32, #tpu.memory_space<vmem>>, vector<18x32xf32>
    %c0_1 = arith.constant 0 : index
    %c0_2 = arith.constant 0 : index
    %1 = vector.load %arg2[%c0_1, %c0_2] : memref<1x32xf32, #tpu.memory_space<vmem>>, vector<1x32xf32>
    %c0_3 = arith.constant 0 : index
    %c0_4 = arith.constant 0 : index
    %2 = vector.load %arg3[%c0_3, %c0_4] : memref<1x32xf32, #tpu.memory_space<vmem>>, vector<1x32xf32>
    %cst = arith.constant dense<0.000000e+00> : vector<18xf32>
    %3 = vector.multi_reduction <add>, %0, %cst [1] : vector<18x32xf32> to vector<18xf32>
    %4 = vector.shape_cast %3 : vector<18xf32> to vector<18x1xf32>
    %cst_5 = arith.constant 3.200000e+01 : f32
    %5 = vector.broadcast %cst_5 : f32 to vector<18x1xf32>
    %6 = arith.divf %4, %5 : vector<18x1xf32>
    %7 = vector.broadcast %6 : vector<18x1xf32> to vector<18x32xf32>
    %8 = arith.subf %0, %7 : vector<18x32xf32>
    %9 = arith.mulf %8, %8 : vector<18x32xf32>
    %cst_6 = arith.constant dense<0.000000e+00> : vector<18xf32>
    %10 = vector.multi_reduction <add>, %9, %cst_6 [1] : vector<18x32xf32> to vector<18xf32>
    %11 = vector.shape_cast %10 : vector<18xf32> to vector<18x1xf32>
    %cst_7 = arith.constant 3.200000e+01 : f32
    %12 = vector.broadcast %cst_7 : f32 to vector<18x1xf32>
    %13 = arith.divf %11, %12 : vector<18x1xf32>
    %14 = vector.broadcast %6 : vector<18x1xf32> to vector<18x32xf32>
    %15 = arith.subf %0, %14 : vector<18x32xf32>
    %cst_8 = arith.constant 9.99999974E-6 : f32
    %16 = vector.broadcast %cst_8 : f32 to vector<18x1xf32>
    %17 = arith.addf %13, %16 : vector<18x1xf32>
    %18 = math.rsqrt %17 : vector<18x1xf32>
    %19 = vector.broadcast %18 : vector<18x1xf32> to vector<18x32xf32>
    %20 = arith.mulf %15, %19 : vector<18x32xf32>
    %21 = vector.broadcast %1 : vector<1x32xf32> to vector<18x32xf32>
    %22 = arith.mulf %20, %21 : vector<18x32xf32>
    %23 = vector.broadcast %2 : vector<1x32xf32> to vector<18x32xf32>
    %24 = arith.addf %22, %23 : vector<18x32xf32>
    %25 = arith.truncf %24 : vector<18x32xf32> to vector<18x32xbf16>
    %c0_9 = arith.constant 0 : index
    %c0_10 = arith.constant 0 : index
    %26 = vector.load %arg4[%c0_9, %c0_10] : memref<18x32xbf16, #tpu.memory_space<vmem>>, vector<18x32xbf16>
    tpu.vector_store %arg4[%c0_9, %c0_10], %25 {strides = array<i32>} : memref<18x32xbf16, #tpu.memory_space<vmem>>, vector<18x32xbf16>,
    return
  }
  func.func @transform_0(%arg0: i32) -> (i32, i32) {
    %c0_i32 = arith.constant 0 : i32
    %c0_i32_0 = arith.constant 0 : i32
    return %arg0, %c0_i32 : i32, i32
  }
  func.func @transform_1(%arg0: i32) -> (i32, i32) {
    %c0_i32 = arith.constant 0 : i32
    %c0_i32_0 = arith.constant 0 : i32
    %c0_i32_1 = arith.constant 0 : i32
    return %c0_i32, %c0_i32_0 : i32, i32
  }
  func.func @transform_2(%arg0: i32) -> (i32, i32) {
    %c0_i32 = arith.constant 0 : i32
    %c0_i32_0 = arith.constant 0 : i32
    %c0_i32_1 = arith.constant 0 : i32
    return %c0_i32, %c0_i32_0 : i32, i32
  }
  func.func @transform_3(%arg0: i32) -> (i32, i32) {
    %c0_i32 = arith.constant 0 : i32
    %c0_i32_0 = arith.constant 0 : i32
    return %arg0, %c0_i32 : i32, i32
  }
}

</mosaic_0001>

<bundles_post_ra>
// kernel: tpu_custom_call.1
= control target key start
LH: loop header
LB: loop body
LE: loop exit
PB: predicated region body
PF: predicated region fallthrough
CT: control target
= control target key end

     0   :  { %7 = vsyncpa [#allocation3], 0  ;;  %s479_s0 = inlined_call_operand.hbm [shape: f32[8,128], index: 0, kind: input, shape index: {}]   ;;  %s480_s1 = inlined_call_operand.hbm [shape: f32[8,128], index: 1, kind: input, shape index: {}]   ;;  %s481_s2 = inlined_call_operand.hbm [shape: f32[8,128], index: 2, kind: output, shape index: {}]  }
   0x1   :  { %8 = vsyncpa [#allocation6], 0 }
   0x2   :  { %9 = vsyncpa [#allocation4], 0  ;;  %s363_s9 = smov 0  }
   0x3 LB: > { %s196_s10 = sadd.s32 4294967295, %s343_s9   ;;  %p197_p0 = scmp.ge.s32.totalorder %s343_s9, 1  ;;  %s343_s9 = sphi %s363_s9, %s15_s9  }
   0x4   : > { %p83_p1 = scmp.lt.s32.totalorder %s343_s9, 3  ;;  %p373_p2 = scmp.eq.s32.totalorder %s196_s10, 0 }
   0x5   : > { %s345_s13 = smov [#allocation2]   ;;  %s346_s15 = smov [#allocation5]  }
   0x6   : > { %s485_s11 = scalar_select %p373_p2, 1, 0 }
   0x7   : > { %p377_p3 = pnand %p197_p0, %p83_p1  ;;  %s96_s14 = sshll.u32 %s345_s13, 4  ;;  %s97_s14 = int_to_ptr.vmem [resolvable:$true] %s96_s14 }
   0x8   : > { %s107_s16 = sshll.u32 %s346_s15, 4  ;;  %s243_s20 = scalar_lea.hbm %s479_s0, 128  ;;  %s389_s16 = int_to_ptr.vmem [resolvable:$true] %s107_s16 }
   0x9   : > { %s486_s12 = scalar_select %p377_p3, 1, 0 }
   0xa   : > { %p219_p4 = pneg %p377_p3  ;;  %p244_p6 = scmp.ne.s32.totalorder %s479_s0, %s243_s20 }
   0xb   : > { %p250_p10 = scmp.lt.u32.totalorder %s243_s20, %s479_s0 }
   0xc   : > { %p385_p5 = pnand %p373_p2, %p219_p4 }
   0xe   : > { %p245_p7 = pneg %p385_p5 }
  0x10   : > { %p246_p8 = pnand %p245_p7, %p244_p6 }
  0x12   : > { %p247_p9 = pneg %p246_p8 }
  0x14   : > { %p252_p11 = pnand %p250_p10, %p247_p9 }
  0x16   : > { %255 = shalt.err (!%p252_p11)
}
  0x17   : > { %s256_s25 = scalar_lea.vmem %s97_s14, 128  ;;  %p264_p1 = scmp.lt.s32.totalorder %s97_s14, %s97_s14 }
  0x18   : > { %p257_p12 = scmp.ne.s32.totalorder %s97_s14, %s256_s25  ;;  %p265_p4 = scmp.lt.s32.totalorder %s256_s25, %s256_s25 }
  0x1a   : > { %p259_p13 = pnand %p257_p12, %p245_p7  ;;  %p266_p2 = por %p265_p4, %p264_p1 }
  0x1c   : > { %p260_p0 = pneg %p259_p13 }
  0x1e   : > { %p267_p3 = pnand %p266_p2, %p260_p0 }
  0x20   : > { %270 = shalt.err (!%p267_p3)
}
  0x21   : > { %222 = dma.hbm_to_vmem [thread:$0]  (!%p385_p5), %s479_s0, 128, %s97_s14, [#allocation3]  }
  0x22   : > { %s271_s30 = scalar_lea.hbm %s480_s1, 128 }
  0x23   : > { %p272_p6 = scmp.ne.s32.totalorder %s480_s1, %s271_s30  ;;  %p278_p3 = scmp.lt.u32.totalorder %s271_s30, %s480_s1 }
  0x25   : > { %p274_p8 = pnand %p272_p6, %p245_p7 }
  0x27   : > { %p275_p2 = pneg %p274_p8 }
  0x29   : > { %p280_p9 = pnand %p278_p3, %p275_p2 }
  0x2b   : > { %283 = shalt.err (!%p280_p9)
}
  0x2c   : > { %s284_s7 = scalar_lea.vmem %s389_s16, 128  ;;  %p292_p13 = scmp.lt.s32.totalorder %s389_s16, %s389_s16 }
  0x2d   : > { %p285_p10 = scmp.ne.s32.totalorder %s389_s16, %s284_s7  ;;  %p293_p0 = scmp.lt.s32.totalorder %s284_s7, %s284_s7 }
  0x2f   : > { %p287_p11 = pnand %p285_p10, %p245_p7  ;;  %p294_p1 = por %p293_p0, %p292_p13 }
  0x31   : > { %p288_p12 = pneg %p287_p11 }
  0x33   : > { %p295_p4 = pnand %p294_p1, %p288_p12 }
  0x35   : > { %298 = shalt.err (!%p295_p4)
}
  0x36   : > { %225 = dma.hbm_to_vmem [thread:$0]  (!%p385_p5), %s480_s1, 128, %s389_s16, [#allocation6]  }
  0x37   : > { %p488_p6 = scmp.ne.s32.totalorder %s486_s12, 0 }
  0x38   : > { %p489_p8 = scmp.ne.s32.totalorder (!%p488_p6), %s485_s11, 0 }
  0x39   : > { %120 = sbr.rel (%p488_p6) target bundleno = 92 (0x5c), region = 28 }
  0x40   : > { %330 = dma.done.wait (%p489_p8), [#allocation3], 128  }
  0x41   : > { %332 = vsyncadd (%p489_p8), [#allocation3], 4294967168 }
  0x42   : > { %334 = dma.done.wait (%p489_p8), [#allocation6], 128  }
  0x43   : > { %336 = vsyncadd (%p489_p8), [#allocation6], 4294967168  ;;  %s347_s14 = smov [#allocation7]   ;;  %v136_v0 = vld [vmem:[#allocation2] sm:$0xff]  ;;  %v137_v1 = vld [vmem:[#allocation5] sm:$0xff]  ;;  %p450_p5 = scmp.eq.s32.totalorder %s196_s10, 1 }
  0x44   : > { %s147_s15 = sshll.u32 %s347_s14, 4  ;;  %v138_v2 = vadd.f32 %v137_v1, %v136_v0  ;;  %s148_s15 = int_to_ptr.vmem [resolvable:$true] %s147_s15 }
  0x45   : > { %s299_s16 = scalar_lea.vmem %s148_s15, 128  ;;  %p306_p9 = scmp.lt.s32.totalorder %s148_s15, %s148_s15 }
  0x46   : > { %139 = vst [vmem:[#allocation7] sm:$0xff] %v138_v2  ;;  %p300_p7 = scmp.ne.s32.totalorder %s148_s15, %s299_s16  ;;  %p307_p10 = scmp.lt.s32.totalorder %s299_s16, %s299_s16 }
  0x48   : > { %p301_p2 = pnand %p300_p7, %p450_p5  ;;  %p308_p11 = por %p307_p10, %p306_p9 }
  0x4a   : > { %p302_p3 = pneg %p301_p2 }
  0x4c   : > { %p309_p12 = pnand %p308_p11, %p302_p3 }
  0x4e   : > { %312 = shalt.err (!%p309_p12)
}
  0x4f   : > { %s313_s10 = scalar_lea.hbm %s481_s2, 128 }
  0x50   : > { %p314_p13 = scmp.ne.s32.totalorder %s481_s2, %s313_s10  ;;  %p319_p4 = scmp.lt.u32.totalorder %s313_s10, %s481_s2 }
  0x52   : > { %p315_p0 = pnand %p314_p13, %p450_p5 }
  0x54   : > { %p316_p1 = pneg %p315_p0 }
  0x56   : > { %p321_p6 = pnand %p319_p4, %p316_p1 }
  0x58   : > { %324 = shalt.err (!%p321_p6)
}
  0x59   : > { %216 = dma.vmem_to_hbm [thread:$0]  (%p450_p5), %s148_s15, 128, %s481_s2, [#allocation4]  }
  0x5a   : > { %338 = dma.done.wait (%p450_p5), [#allocation4], 128  }
  0x5b   : > { %340 = vsyncadd (%p450_p5), [#allocation4], 4294967168 }
  0x5c PF: > { %s15_s9 = sadd.s32 1, %s343_s9  }
  0x5d   : > { %p12_p8 = scmp.ge.s32.totalorder %s15_s9, 4  }
  0x5f   :  { %14 = sbr.rel (!%p12_p8) target bundleno = 3 (0x3), region = 61 }
  0x66   :  { %160 = vsyncpa [#allocation3], 1 }
  0x67   :  { %162 = vsyncpa [#allocation3 + $0x1], 1 }
  0x68   :  { %163 = vsyncpa [#allocation6], 1 }
  0x69   :  { %164 = vsyncpa [#allocation4], 1 }
  0x6a   :  { %166 = vsyncpa [#allocation4 + $0x1], 1 }

// kernel: tpu_custom_call.1
= control target key start
LH: loop header
LB: loop body
LE: loop exit
PB: predicated region body
PF: predicated region fallthrough
CT: control target
= control target key end

     0   :  { %8 = vsyncpa [#allocation3], 0  ;;  %s259_s0 = inlined_call_operand.hbm [shape: f32[18,32], index: 0, kind: input, shape index: {}]   ;;  %s260_s1 = inlined_call_operand.vmem [shape: f32[1,32], index: 1, kind: input, shape index: {}]   ;;  %s261_s2 = inlined_call_operand.vmem [shape: f32[1,32], index: 2, kind: input, shape index: {}]   ;;  %s262_s3 = inlined_call_operand.hbm [shape: bf16[18,32], index: 3, kind: output, shape index: {}]  }
   0x1   :  { %9 = vsyncpa [#allocation4], 0  ;;  %s197_s12 = smov [#allocation2]   ;;  %s149_s16 = scalar_lea.hbm %s259_s0, 384 }
   0x2   :  { %s15_s13 = sshll.u32 %s197_s12, 4  ;;  %p150_p0 = scmp.ne.s32.totalorder %s259_s0, %s149_s16  ;;  %s16_s13 = int_to_ptr.vmem [resolvable:$true] %s15_s13 }
   0x3   :  { %p153_p1 = scmp.lt.u32.totalorder %s149_s16, %s259_s0 }
   0x5   :  { %p155_p2 = pnand %p153_p1, %p150_p0 }
   0x7   :  { %158 = shalt.err (!%p155_p2)
}
   0x8   :  { %s159_s21 = scalar_lea.vmem %s16_s13, 384  ;;  %p164_p4 = scmp.lt.s32.totalorder %s16_s13, %s16_s13 }
   0x9   :  { %p160_p3 = scmp.ne.s32.totalorder %s16_s13, %s159_s21  ;;  %p165_p5 = scmp.lt.s32.totalorder %s159_s21, %s159_s21 }
   0xb   :  { %p166_p6 = por %p165_p5, %p164_p4 }
   0xd   :  { %p167_p7 = pnand %p166_p6, %p160_p3 }
   0xf   :  { %170 = shalt.err (!%p167_p7)
}
  0x10   :  { %s198_s22 = smov 128   ;;  %s199_s23 = smov 8  }
  0x11   :  { %21 = dma.hbm_to_vmem [thread:$0]  %s259_s0, 384, %s16_s13, [#allocation3], %s198_s22, %s198_s22, %s199_s23  }
  0x12   :  { %193 = dma.done.wait [#allocation3], 384  }
  0x13   :  { %194 = vsyncadd [#allocation3], 4294966912  ;;  %vm34_vm0 = vcmask 261120   ;;  %vm41_vm1 = vcmask 254976   ;;  %v29_v0 = vld [vmem:[#allocation2] sm:$0xff]  ;;  %v30_v2 = vld [vmem:[#allocation2 + $0x8] sm:$0xff] }
  0x14   :  { %v31_v1 = vld [vmem:[#allocation2 + $0x10] sm:$0x3]  ;;  %v35_v3 = vsel %vm34_vm0, %v29_v0, 0.0  ;;  %v38_v5 = vsel %vm34_vm0, %v30_v2, 0.0  ;;  %v129_v31 = vld [vmem:[%s260_s1] ss:$0 sm:$0xff] }
  0x15   :  { %v42_v4 = vsel %vm41_vm1, %v31_v1, 0.0  ;;  %36 = vadd.xlane.f32.xlu0 %v35_v3  ;;  %v130_v33 = vld [vmem:[%s261_s2] ss:$0 sm:$0xff]  ;;  %vm107_vm2 = vcmask 257024   ;;  %s200_s29 = smov [#allocation5]   ;;  %vm110_vm3 = vcmask 253952  }
  0x16   :  { %43 = vadd.xlane.f32.xlu1 %v42_v4  ;;  %s117_s30 = sshll.u32 %s200_s29, 4  ;;  %s118_s30 = int_to_ptr.vmem [resolvable:$true] %s117_s30 }
  0x17   :  { %s171_s1 = scalar_lea.vmem %s118_s30, 192  ;;  %p176_p9 = scmp.lt.s32.totalorder %s118_s30, %s118_s30 }
  0x18   :  { %p172_p8 = scmp.ne.s32.totalorder %s118_s30, %s171_s1  ;;  %p177_p10 = scmp.lt.s32.totalorder %s171_s1, %s171_s1 }
  0x19   :  { %39 = vadd.xlane.f32.xlu0 %v38_v5 }
  0x1a   :  { %p178_p11 = por %p177_p10, %p176_p9 }
  0x1c   :  { %p179_p12 = pnand %p178_p11, %p172_p8 }
  0xa2   :  { %v37_v6 = vpop.xlane.xlu0 %36 }
  0xa3   :  { %v44_v7 = vpop.xlane.xlu1 %43  ;;  %v46_v8 = vmul.f32 0.03125, %v37_v6 }
  0xa4   :  { %v48_v9 = vmul.f32 0.03125, %v44_v7 }
  0xa5   :  { %v49_v10 = vsub.f32 %v29_v0, %v46_v8 }
  0xa6   :  { %v51_v11 = vsub.f32 %v31_v1, %v48_v9  ;;  %v40_v12 = vpop.xlane.xlu0 %39 }
  0xa7   :  { %v47_v13 = vmul.f32 0.03125, %v40_v12  ;;  %v52_v14 = vmul.f32 %v49_v10, %v49_v10 }
  0xa8   :  { %v54_v15 = vmul.f32 %v51_v11, %v51_v11 }
  0xa9   :  { %v50_v16 = vsub.f32 %v30_v2, %v47_v13  ;;  %v55_v17 = vsel %vm34_vm0, %v52_v14, 0.0 }
  0xaa   :  { %56 = vadd.xlane.f32.xlu1 %v55_v17  ;;  %v61_v18 = vsel %vm41_vm1, %v54_v15, 0.0 }
  0xab   :  { %v53_v19 = vmul.f32 %v50_v16, %v50_v16 }
  0xad   :  { %v58_v20 = vsel %vm34_vm0, %v53_v19, 0.0 }
  0xae   :  { %62 = vadd.xlane.f32.xlu1 %v61_v18  ;;  %59 = vadd.xlane.f32.xlu0 %v58_v20 }
 0x137   :  { %v57_v21 = vpop.xlane.xlu1 %56 }
 0x138   :  { %v64_v22 = vmul.f32 0.03125, %v57_v21 }
 0x13a   :  { %v67_v23 = vadd.f32 1e-05, %v64_v22 }
 0x13b   :  { %v63_v24 = vpop.xlane.xlu1 %62  ;;  %v60_v25 = vpop.xlane.xlu0 %59 }
 0x13c   :  { %143 = vrsqrt.f32 %v67_v23  ;;  %v66_v26 = vmul.f32 0.03125, %v63_v24  ;;  %v65_v27 = vmul.f32 0.03125, %v60_v25 }
 0x13e   :  { %v69_v28 = vadd.f32 1e-05, %v66_v26  ;;  %v68_v29 = vadd.f32 1e-05, %v65_v27 }
 0x140   :  { %145 = vrsqrt.f32 %v69_v28 }
 0x141   :  { %147 = vrsqrt.f32 %v68_v29 }
 0x146   :  { %v144_v30 = vpop.eup %143 }
 0x147   :  { %v73_v32 = vmul.f32 %v144_v30, %v49_v10 }
 0x149   :  { %v82_v34 = vmul.f32 %v129_v31, %v73_v32 }
 0x14a   :  { %v146_v35 = vpop.eup %145 }
 0x14b   :  { %v148_v36 = vpop.eup %147  ;;  %v91_v37 = vadd.f32 %v130_v33, %v82_v34  ;;  %v75_v38 = vmul.f32 %v146_v35, %v51_v11 }
 0x14c   :  { %v74_v39 = vmul.f32 %v148_v36, %v50_v16 }
 0x14d   :  { %v84_v40 = vmul.f32 %v129_v31, %v75_v38  ;;  %v134_v41 = vpack.c.bf16 %v91_v37, %v91_v37 }
 0x14e   :  { %v83_v42 = vmul.f32 %v129_v31, %v74_v39 }
 0x14f   :  { %v93_v43 = vadd.f32 %v130_v33, %v84_v40  ;;  %108 = vst.msk [vmem:[#allocation5] sm:$0xf] %vm107_vm2, %v134_v41 }
 0x150   :  { %v92_v44 = vadd.f32 %v130_v33, %v83_v42 }
 0x151   :  { %v136_v45 = vpack.c.bf16 %v93_v43, %v93_v43 }
 0x152   :  { %v135_v46 = vpack.c.bf16 %v92_v44, %v92_v44 }
 0x153   :  { %111 = vst.msk [vmem:[#allocation5 + $0x8] sm:$0x1] %vm110_vm3, %v136_v45 }
 0x154   :  { %109 = vst.msk [vmem:[#allocation5 + $0x4] sm:$0xf] %vm107_vm2, %v135_v46 }
 0x155   :  { %182 = shalt.err (!%p179_p12)
}
 0x156   :  { %s183_s5 = scalar_lea.hbm %s262_s3, 192 }
 0x157   :  { %p184_p13 = scmp.ne.s32.totalorder %s262_s3, %s183_s5  ;;  %p187_p0 = scmp.lt.u32.totalorder %s183_s5, %s262_s3 }
 0x159   :  { %p189_p1 = pnand %p187_p0, %p184_p13 }
 0x15b   :  { %192 = shalt.err (!%p189_p1)
}
 0x15c   :  { %s201_s10 = smov 64   ;;  %s202_s11 = smov 4  }
 0x15d   :  { %123 = dma.vmem_to_hbm [thread:$0]  %s118_s30, 192, %s262_s3, [#allocation4], %s201_s10, %s201_s10, %s202_s11  }
 0x15e   :  { %195 = dma.done.wait [#allocation4], 192  }
 0x15f   :  { %196 = vsyncadd [#allocation4], 4294967104 }
 0x160   :  { %127 = vsyncpa [#allocation3], 1 }
 0x161   :  { %128 = vsyncpa [#allocation4], 1 }

</bundles_post_ra>
